<compile_context>
chip_gen: v7x
topology: tpu7x:2x2x1
jax: 0.10.0
libtpu: 0.0.40
codegen_flags: <defaults>
</compile_context>

<pallas_src>
import functools

import jax
import jax.numpy as jnp
import numpy as np
from jax.experimental import pallas as pl
from jax.experimental.pallas import tpu as pltpu


# ----------------------------------------------------------------------------
# Pallas kernel: one row-tile of  logits = x @ W^T + b  followed by
# log_softmax / softmax / identity over the vocab (last) dimension.
# ----------------------------------------------------------------------------
def _generator_kernel(x_ref, wt_ref, b_ref, out_ref, *, mode):
    logits = (jnp.dot(x_ref[...], wt_ref[...],
                      preferred_element_type=jnp.float32)
              + b_ref[...])                              # (rows, V) f32, MXU + VPU
    if mode == "linear":
        out = logits
    else:
        m = jnp.max(logits, axis=-1, keepdims=True)      # XLU reduce
        shifted = logits - m
        e = jnp.exp(shifted)                             # EUP
        s = jnp.sum(e, axis=-1, keepdims=True)
        if mode == "log_softmax":
            out = shifted - jnp.log(s)
        else:  # "softmax"
            out = e / s
    out_ref[...] = out.astype(out_ref.dtype)


def generator_project(x, weight, bias, *, mode="log_softmax"):
    """x: (N, D) f32.  weight: (V, D) (PyTorch nn.Linear layout).  bias: (V,)."""
    n, d = x.shape
    v = weight.shape[0]
    assert weight.shape == (v, d) and bias.shape == (v,)

    # Row tiling: single grid step when everything trivially fits VMEM
    # (the common decode/eval case); otherwise 128-row tiles, axis "parallel".
    block_rows = max(8, -(-n // 8) * 8) if n <= 512 else 128
    n_pad = -(-n // block_rows) * block_rows
    if n_pad != n:
        x = jnp.pad(x, ((0, n_pad - n), (0, 0)))

    kernel = functools.partial(_generator_kernel, mode=mode)
    out = pl.pallas_call(
        kernel,
        out_shape=jax.ShapeDtypeStruct((n_pad, v), jnp.float32),
        grid_spec=pltpu.PrefetchScalarGridSpec(
            num_scalar_prefetch=0,
            grid=(n_pad // block_rows,),
            in_specs=[
                pl.BlockSpec((block_rows, d), lambda i: (i, 0)),   # activations
                pl.BlockSpec((d, v), lambda i: (0, 0)),            # W^T (resident)
                pl.BlockSpec((1, v), lambda i: (0, 0)),            # bias (resident)
            ],
            out_specs=pl.BlockSpec((block_rows, v), lambda i: (i, 0)),
        ),
        compiler_params=pltpu.CompilerParams(
            dimension_semantics=("parallel",)),   # rows independent (v7x: 2 TCs)
    )(x, weight.T, bias.reshape(1, v))
    return out[:n]


# ----------------------------------------------------------------------------
# Generator.forward / switchID
# ----------------------------------------------------------------------------
def generator_forward(params, x, *, softmax=True, return_log=True):
    w, b = params["linears"][params["current_id"]]
    if not softmax:
        mode = "linear"
    elif return_log:
        mode = "log_softmax"
    else:
        mode = "softmax"
    return generator_project(x, w, b, mode=mode)


def switch_id(params, tgt_id):
    # TODO(synk): hardSwitchID(reset_zero=True) re-initializes the selected
    # head's weights in-place; only the forward-pass head selection is mirrored.
    return dict(params, current_id=int(tgt_id))


# ----------------------------------------------------------------------------
# Pure-JAX reference (for correctness check).
# ----------------------------------------------------------------------------
def ref_generator_forward(params, x, *, softmax=True, return_log=True):
    w, b = params["linears"][params["current_id"]]
    logits = x @ w.T + b
    if not softmax:
        return logits
    if return_log:
        return jax.nn.log_softmax(logits, axis=-1)
    return jax.nn.softmax(logits, axis=-1)


if __name__ == "__main__":
    # opt.rnn_size = 32; two target dictionaries (MultiLinear heads).
    RNN_SIZE = 32
    VOCABS = [512, 256]          # dicts[i].size(); lane-dense (multiples of 128)
    T, B = 8, 2
    N = T * B                    # decoder states flattened to (T*B, rnn_size)

    key = jax.random.PRNGKey(0)
    keys = jax.random.split(key, 1 + 2 * len(VOCABS))
    x = jax.random.normal(keys[0], (N, RNN_SIZE), jnp.float32)

    linears = []
    bound = 1.0 / np.sqrt(RNN_SIZE)          # PyTorch nn.Linear uniform(-k, k)
    for j, vsz in enumerate(VOCABS):
        w = jax.random.uniform(keys[1 + 2 * j], (vsz, RNN_SIZE), jnp.float32,
                               -bound, bound)
        b = jax.random.uniform(keys[2 + 2 * j], (vsz,), jnp.float32, -bound, bound)
        linears.append((w, b))
    params = {"linears": linears, "current_id": 0}

    # Default path: linear -> log_softmax on dictionary 0.
    out0 = jax.block_until_ready(generator_forward(params, x))
    ref0 = ref_generator_forward(params, x)
    assert out0.shape == (N, VOCABS[0])
    np.testing.assert_allclose(np.asarray(out0), np.asarray(ref0),
                               rtol=1e-4, atol=1e-4)

    # switchID(1): second dictionary, softmax (non-log) branch.
    params = switch_id(params, 1)
    out1 = jax.block_until_ready(generator_forward(params, x, return_log=False))
    ref1 = ref_generator_forward(params, x, return_log=False)
    assert out1.shape == (N, VOCABS[1])
    np.testing.assert_allclose(np.asarray(out1), np.asarray(ref1),
                               rtol=1e-4, atol=1e-4)

    # softmax=False branch: raw logits.
    out2 = jax.block_until_ready(generator_forward(params, x, softmax=False))
    ref2 = ref_generator_forward(params, x, softmax=False)
    np.testing.assert_allclose(np.asarray(out2), np.asarray(ref2),
                               rtol=1e-4, atol=1e-4)

    print("KERNEL_OK")
</pallas_src>

<mosaic_0001>
module attributes {stable_mosaic.version = 11 : i64} {
  func.func @_generator_kernel(%arg0: i32, %arg1: memref<16x32xf32, #tpu.memory_space<vmem>>, %arg2: memref<32x512xf32, #tpu.memory_space<vmem>>, %arg3: memref<1x512xf32, #tpu.memory_space<vmem>>, %arg4: memref<16x512xf32, #tpu.memory_space<vmem>>) attributes {dimension_semantics = [#tpu.dimension_semantics<parallel>], iteration_bounds = array<i64: 1>, scalar_prefetch = 0 : i64, scratch_operands = 0 : i64, tpu.core_type = #tpu.core_type<tc>, window_params = [{transform_indices = @transform_0, window_bounds = array<i64: 16, 32>}, {pipeline_mode = #tpu.pipeline_mode<synchronous>, transform_indices = @transform_1, window_bounds = array<i64: 32, 512>}, {pipeline_mode = #tpu.pipeline_mode<synchronous>, transform_indices = @transform_2, window_bounds = array<i64: 1, 512>}, {transform_indices = @transform_3, window_bounds = array<i64: 16, 512>}]} {
    %c0 = arith.constant 0 : index
    %c0_0 = arith.constant 0 : index
    %0 = vector.load %arg1[%c0, %c0_0] : memref<16x32xf32, #tpu.memory_space<vmem>>, vector<16x32xf32>
    %c0_1 = arith.constant 0 : index
    %c0_2 = arith.constant 0 : index
    %1 = vector.load %arg2[%c0_1, %c0_2] : memref<32x512xf32, #tpu.memory_space<vmem>>, vector<32x512xf32>
    %cst = arith.constant dense<0.000000e+00> : vector<16x512xf32>
    %2 = tpu.matmul %0, %1, %cst {dimension_numbers = #tpu.dot_dimension_numbers<[1], [0], [0], [1], [0, 0, 1, 1], [], []>} : vector<16x32xf32>, vector<32x512xf32>, vector<16x512xf32> -> vector<16x512xf32>
    %c0_3 = arith.constant 0 : index
    %c0_4 = arith.constant 0 : index
    %3 = vector.load %arg3[%c0_3, %c0_4] : memref<1x512xf32, #tpu.memory_space<vmem>>, vector<1x512xf32>
    %4 = vector.broadcast %3 : vector<1x512xf32> to vector<16x512xf32>
    %5 = arith.addf %2, %4 : vector<16x512xf32>
    %cst_5 = arith.constant dense<0xFF800000> : vector<16xf32>
    %6 = vector.multi_reduction <maximumf>, %5, %cst_5 [1] : vector<16x512xf32> to vector<16xf32>
    %7 = vector.shape_cast %6 : vector<16xf32> to vector<16x1xf32>
    %8 = vector.broadcast %7 : vector<16x1xf32> to vector<16x512xf32>
    %9 = arith.subf %5, %8 : vector<16x512xf32>
    %10 = math.exp %9 : vector<16x512xf32>
    %cst_6 = arith.constant dense<0.000000e+00> : vector<16xf32>
    %11 = vector.multi_reduction <add>, %10, %cst_6 [1] : vector<16x512xf32> to vector<16xf32>
    %12 = vector.shape_cast %11 : vector<16xf32> to vector<16x1xf32>
    %13 = math.log %12 : vector<16x1xf32>
    %14 = vector.broadcast %13 : vector<16x1xf32> to vector<16x512xf32>
    %15 = arith.subf %9, %14 : vector<16x512xf32>
    %c0_7 = arith.constant 0 : index
    %c0_8 = arith.constant 0 : index
    %16 = vector.load %arg4[%c0_7, %c0_8] : memref<16x512xf32, #tpu.memory_space<vmem>>, vector<16x512xf32>
    tpu.vector_store %arg4[%c0_7, %c0_8], %15 {strides = array<i32>} : memref<16x512xf32, #tpu.memory_space<vmem>>, vector<16x512xf32>,
    return
  }
  func.func @transform_0(%arg0: i32) -> (i32, i32) {
    %c0_i32 = arith.constant 0 : i32
    %c0_i32_0 = arith.constant 0 : i32
    return %arg0, %c0_i32 : i32, i32
  }
  func.func @transform_1(%arg0: i32) -> (i32, i32) {
    %c0_i32 = arith.constant 0 : i32
    %c0_i32_0 = arith.constant 0 : i32
    %c0_i32_1 = arith.constant 0 : i32
    return %c0_i32, %c0_i32_0 : i32, i32
  }
  func.func @transform_2(%arg0: i32) -> (i32, i32) {
    %c0_i32 = arith.constant 0 : i32
    %c0_i32_0 = arith.constant 0 : i32
    %c0_i32_1 = arith.constant 0 : i32
    return %c0_i32, %c0_i32_0 : i32, i32
  }
  func.func @transform_3(%arg0: i32) -> (i32, i32) {
    %c0_i32 = arith.constant 0 : i32
    %c0_i32_0 = arith.constant 0 : i32
    return %arg0, %c0_i32 : i32, i32
  }
}

</mosaic_0001>

<bundles_post_ra>
// kernel: tpu_custom_call.1
= control target key start
LH: loop header
LB: loop body
LE: loop exit
PB: predicated region body
PF: predicated region fallthrough
CT: control target
= control target key end

     0   :  { %8 = vsyncpa [#allocation3], 0  ;;  %s519_s0 = inlined_call_operand.hbm [shape: f32[16,32], index: 0, kind: input, shape index: {}]   ;;  %s520_s1 = inlined_call_operand.hbm [shape: f32[32,512], index: 1, kind: input, shape index: {}]   ;;  %s521_s2 = inlined_call_operand.vmem [shape: f32[1,512], index: 2, kind: input, shape index: {}]   ;;  %s522_s3 = inlined_call_operand.hbm [shape: f32[16,512], index: 3, kind: output, shape index: {}]  }
   0x1   :  { %9 = vsyncpa [#allocation6], 0 }
   0x2   :  { %10 = vsyncpa [#allocation4], 0  ;;  %s446_s12 = smov [#allocation2]   ;;  %s374_s16 = scalar_lea.hbm %s519_s0, 256 }
   0x3   :  { %s16_s13 = sshll.u32 %s446_s12, 4  ;;  %p375_p0 = scmp.ne.s32.totalorder %s519_s0, %s374_s16  ;;  %s17_s13 = int_to_ptr.vmem [resolvable:$true] %s16_s13 }
   0x4   :  { %p378_p1 = scmp.lt.u32.totalorder %s374_s16, %s519_s0 }
   0x6   :  { %p380_p2 = pnand %p378_p1, %p375_p0 }
   0x8   :  { %383 = shalt.err (!%p380_p2)
}
   0x9   :  { %s384_s21 = scalar_lea.vmem %s17_s13, 256  ;;  %p389_p4 = scmp.lt.s32.totalorder %s17_s13, %s17_s13 }
   0xa   :  { %p385_p3 = scmp.ne.s32.totalorder %s17_s13, %s384_s21  ;;  %p390_p5 = scmp.lt.s32.totalorder %s384_s21, %s384_s21 }
   0xc   :  { %p391_p6 = por %p390_p5, %p389_p4 }
   0xe   :  { %p392_p7 = pnand %p391_p6, %p385_p3 }
  0x10   :  { %395 = shalt.err (!%p392_p7)
}
  0x11   :  { %s447_s22 = smov 128   ;;  %s448_s23 = smov 8  }
  0x12   :  { %22 = dma.hbm_to_vmem [thread:$0]  %s519_s0, 256, %s17_s13, [#allocation3], %s447_s22, %s447_s22, %s448_s23  }
  0x13   :  { %s449_s26 = smov [#allocation5]   ;;  %s396_s30 = scalar_lea.hbm %s520_s1, 2048 }
  0x14   :  { %s28_s27 = sshll.u32 %s449_s26, 4  ;;  %p397_p8 = scmp.ne.s32.totalorder %s520_s1, %s396_s30  ;;  %s29_s27 = int_to_ptr.vmem [resolvable:$true] %s28_s27 }
  0x15   :  { %p400_p9 = scmp.lt.u32.totalorder %s396_s30, %s520_s1 }
  0x17   :  { %p402_p10 = pnand %p400_p9, %p397_p8 }
  0x19   :  { %405 = shalt.err (!%p402_p10)
}
  0x1a   :  { %s406_s8 = scalar_lea.vmem %s29_s27, 2048  ;;  %p411_p12 = scmp.lt.s32.totalorder %s29_s27, %s29_s27 }
  0x1b   :  { %p407_p11 = scmp.ne.s32.totalorder %s29_s27, %s406_s8  ;;  %p412_p13 = scmp.lt.s32.totalorder %s406_s8, %s406_s8 }
  0x1d   :  { %p413_p0 = por %p412_p13, %p411_p12 }
  0x1f   :  { %p414_p1 = pnand %p413_p0, %p407_p11 }
  0x21   :  { %417 = shalt.err (!%p414_p1)
}
  0x22   :  { %s450_s0 = smov 512   ;;  %s451_s9 = smov 32  }
  0x23   :  { %34 = dma.hbm_to_vmem [thread:$0]  %s520_s1, 2048, %s29_s27, [#allocation6], %s450_s0, %s450_s0, %s451_s9  }
  0x24   :  { %440 = dma.done.wait [#allocation3], 256  }
  0x25   :  { %441 = vsyncadd [#allocation3], 4294967040 }
  0x26   :  { %442 = dma.done.wait [#allocation6], 2048  }
  0x27   :  { %443 = vsyncadd [#allocation6], 4294965248  ;;  %v452_v0 = vmov 0.0   ;;  %v46_v1 = vld [vmem:[#allocation5 + $0x8] sm:$0xff]  ;;  %v48_v3 = vld [vmem:[#allocation5 + $0x18] sm:$0xff]  ;;  %vm83_vm0 = vcmask 261120   ;;  %v63_v27 = vlaneseq }
  0x28   :  { %154 = vmatprep.mubr.f32.mxu0 %v452_v0  ;;  %231 = vmatprep.mubr.f32.mxu1 %v452_v0  ;;  %v50_v2 = vld [vmem:[#allocation5 + $0x28] sm:$0xff]  ;;  %v52_v5 = vld [vmem:[#allocation5 + $0x38] sm:$0xff]  ;;  %v45_v6 = vld [vmem:[#allocation5] sm:$0xff] }
  0x29   :  { %v330_v4 = vpack.c.bf16 %v50_v2, %v46_v1  ;;  %v49_v7 = vld [vmem:[#allocation5 + $0x20] sm:$0xff]  ;;  %v338_v8 = vpack.c.bf16 %v52_v5, %v48_v3  ;;  %v47_v10 = vld [vmem:[#allocation5 + $0x10] sm:$0xff]  ;;  %v54_v12 = vld [vmem:[#allocation5 + $0x48] sm:$0xff]  ;;  %v64_v28 = vshrl.u32 %v63_v27, 7 }
  0x2a   :  { %v332_v9 = vpack.c.bf16 %v49_v7, %v45_v6  ;;  %v51_v11 = vld [vmem:[#allocation5 + $0x30] sm:$0xff]  ;;  %v58_v14 = vld [vmem:[#allocation5 + $0x68] sm:$0xff]  ;;  %v56_v15 = vld [vmem:[#allocation5 + $0x58] sm:$0xff] }
  0x2b   :  { %331 = vmatprep.subr.bf16.mxu0 %v330_v4  ;;  %v340_v13 = vpack.c.bf16 %v51_v11, %v47_v10  ;;  %v60_v16 = vld [vmem:[#allocation5 + $0x78] sm:$0xff]  ;;  %339 = vmatprep.subr.bf16.mxu1 %v338_v8  ;;  %v334_v17 = vpack.c.bf16 %v58_v14, %v54_v12  ;;  %v53_v19 = vld [vmem:[#allocation5 + $0x40] sm:$0xff]  ;;  %v55_v21 = vld [vmem:[#allocation5 + $0x50] sm:$0xff]  ;;  %v65_v29 = vsub.s32 0, %v64_v28  ;;  %v73_v31 = vsub.s32 2, %v64_v28 }
  0x2c   :  { %333 = vmatpush1.bf16.msra.mxu0 %v332_v9  ;;  %v342_v18 = vpack.c.bf16 %v60_v16, %v56_v15  ;;  %v57_v20 = vld [vmem:[#allocation5 + $0x60] sm:$0xff]  ;;  %v59_v23 = vld [vmem:[#allocation5 + $0x70] sm:$0xff]  ;;  %v44_v26 = vld [vmem:[#allocation2 + $0x8] sm:$0xff]  ;;  %v69_v32 = vsub.s32 1, %v64_v28  ;;  %v77_v33 = vsub.s32 3, %v64_v28 }
  0x2d   :  { %341 = vmatpush1.bf16.msra.mxu1 %v340_v13  ;;  %v336_v22 = vpack.c.bf16 %v57_v20, %v53_v19  ;;  %335 = vmatprep.subr.bf16.mxu0 %v334_v17  ;;  %v344_v24 = vpack.c.bf16 %v59_v23, %v55_v21  ;;  %v43_v25 = vld [vmem:[#allocation2] sm:$0xff] }
  0x2e   :  { %343 = vmatprep.subr.bf16.mxu1 %v342_v18  ;;  %v61_v30 = vld [vmem:[%s521_s2] sm:$0xf]  ;;  %s453_s2 = smov [#allocation7]  }
  0x2f   :  { %v66_v34 = vrot.slane %v61_v30, %v65_v29  ;;  %v74_v35 = vrot.slane %v61_v30, %v73_v31  ;;  %v70_v36 = vrot.slane %v61_v30, %v69_v32  ;;  %v78_v37 = vrot.slane %v61_v30, %v77_v33  ;;  %s313_s13 = sshll.u32 %s453_s2, 4  ;;  %s314_s13 = int_to_ptr.vmem [resolvable:$true] %s313_s13 }
  0x30   :  { %337 = vmatpush1.bf16.msra.mxu0 %v336_v22  ;;  %s418_s14 = scalar_lea.vmem %s314_s13, 1024  ;;  %p423_p3 = scmp.lt.s32.totalorder %s314_s13, %s314_s13 }
  0x31   :  { %345 = vmatpush1.bf16.msra.mxu1 %v344_v24  ;;  %p419_p2 = scmp.ne.s32.totalorder %s314_s13, %s418_s14  ;;  %p424_p4 = scmp.lt.s32.totalorder %s418_s14, %s418_s14 }
  0x33   :  { %326 = vmatmul.mubr.msk.f32.vlgmr.msra.gmra.mrb[0].mxu0 %vm83_vm0, %v43_v25  ;;  %p425_p5 = por %p424_p4, %p423_p3 }
  0x34   :  { %328 = vmatmul.mubr.msk.f32.vlgmr.msra.gmra.mrb[0].mxu1 %vm83_vm0, %v43_v25  ;;  %160 = vmatprep.mubr.f32.mxu0 %v452_v0 }
  0x35   :  { %237 = vmatprep.mubr.f32.mxu1 %v452_v0  ;;  %p426_p6 = pnand %p425_p5, %p419_p2 }
  0x37   :  { %327 = vmatmul.mubr.msk.f32.gmra.mrb[2].mxu0 %vm83_vm0, %v44_v26 }
  0x38   :  { %329 = vmatmul.mubr.msk.f32.gmra.mrb[2].mxu1 %vm83_vm0, %v44_v26 }
 0x106   :  { %v156_v38 = vpop.f32.mrb[0].mxu0 }
 0x107   :  { %v157_v39 = vadd.f32 %v156_v38, %v66_v34  ;;  %v233_v40 = vpop.f32.mrb[0].mxu1  ;;  %v158_v41 = vpop.f32.mrb[1].mxu0 }
 0x108   :  { %v234_v42 = vadd.f32 %v233_v40, %v74_v35  ;;  %v159_v43 = vadd.f32 %v158_v41, %v70_v36  ;;  %v235_v44 = vpop.f32.mrb[1].mxu1 }
 0x109   :  { %v236_v45 = vadd.f32 %v235_v44, %v78_v37 }
 0x10a   :  { %v162_v46 = vpop.f32.mrb[2].mxu0  ;;  %v244_v47 = vmax.f32 %v157_v39, %v234_v42 }
 0x10b   :  { %v163_v48 = vadd.f32 %v162_v46, %v66_v34  ;;  %v239_v49 = vpop.f32.mrb[2].mxu1  ;;  %v164_v50 = vpop.f32.mrb[3].mxu0  ;;  %v245_v51 = vmax.f32 %v159_v43, %v236_v45 }
 0x10c   :  { %v240_v52 = vadd.f32 %v239_v49, %v74_v35  ;;  %v165_v53 = vadd.f32 %v164_v50, %v70_v36  ;;  %v241_v54 = vpop.f32.mrb[3].mxu1 }
 0x10d   :  { %v242_v55 = vadd.f32 %v241_v54, %v78_v37  ;;  %v246_v56 = vmax.f32 %v244_v47, %v245_v51 }
 0x10e   :  { %v249_v57 = vmax.f32 %v163_v48, %v240_v52 }
 0x10f   :  { %v250_v58 = vmax.f32 %v165_v53, %v242_v55  ;;  %247 = vmax.xlane.f32.xlu0 %v246_v56 }
 0x111   :  { %v251_v59 = vmax.f32 %v249_v57, %v250_v58 }
 0x113   :  { %252 = vmax.xlane.f32.xlu0 %v251_v59 }
 0x19c   :  { %v248_v60 = vpop.xlane.xlu0 %247 }
 0x19d   :  { %v254_v61 = vsub.f32 %v157_v39, %v248_v60  ;;  %v255_v62 = vsub.f32 %v159_v43, %v248_v60  ;;  %v256_v63 = vsub.f32 %v234_v42, %v248_v60  ;;  %v257_v0 = vsub.f32 %v236_v45, %v248_v60 }
 0x19f   :  { %v262_v1 = vmul.f32 1.442695, %v254_v61  ;;  %v264_v2 = vmul.f32 1.442695, %v255_v62  ;;  %v266_v3 = vmul.f32 1.442695, %v256_v63 }
 0x1a0   :  { %v268_v4 = vmul.f32 1.442695, %v257_v0  ;;  %v253_v5 = vpop.xlane.xlu0 %252 }
 0x1a1   :  { %354 = vpow2.f32 %v262_v1  ;;  %v258_v6 = vsub.f32 %v163_v48, %v253_v5  ;;  %v259_v7 = vsub.f32 %v165_v53, %v253_v5  ;;  %v260_v8 = vsub.f32 %v240_v52, %v253_v5 }
 0x1a2   :  { %356 = vpow2.f32 %v264_v2  ;;  %v261_v9 = vsub.f32 %v242_v55, %v253_v5 }
 0x1a3   :  { %358 = vpow2.f32 %v266_v3  ;;  %v270_v10 = vmul.f32 1.442695, %v258_v6  ;;  %v272_v11 = vmul.f32 1.442695, %v259_v7  ;;  %v274_v12 = vmul.f32 1.442695, %v260_v8 }
 0x1a4   :  { %360 = vpow2.f32 %v268_v4  ;;  %v276_v13 = vmul.f32 1.442695, %v261_v9 }
 0x1a5   :  { %362 = vpow2.f32 %v270_v10 }
 0x1a6   :  { %364 = vpow2.f32 %v272_v11 }
 0x1a7   :  { %366 = vpow2.f32 %v274_v12 }
 0x1a8   :  { %368 = vpow2.f32 %v276_v13 }
 0x1ab   :  { %v355_v14 = vpop.eup %354 }
 0x1ac   :  { %v357_v15 = vpop.eup %356 }
 0x1ad   :  { %v359_v16 = vpop.eup %358  ;;  %v278_v17 = vadd.f32 %v357_v15, %v355_v14 }
 0x1ae   :  { %v361_v18 = vpop.eup %360 }
 0x1af   :  { %v363_v19 = vpop.eup %362  ;;  %v279_v20 = vadd.f32 %v359_v16, %v278_v17 }
 0x1b0   :  { %v365_v21 = vpop.eup %364 }
 0x1b1   :  { %v280_v22 = vadd.f32 %v361_v18, %v279_v20  ;;  %v283_v23 = vadd.f32 %v365_v21, %v363_v19  ;;  %v367_v24 = vpop.eup %366 }
 0x1b2   :  { %v369_v26 = vpop.eup %368 }
 0x1b3   :  { %281 = vadd.xlane.f32.xlu1 %v280_v22  ;;  %v284_v25 = vadd.f32 %v367_v24, %v283_v23 }
 0x1b5   :  { %v285_v27 = vadd.f32 %v369_v26, %v284_v25 }
 0x1b7   :  { %286 = vadd.xlane.f32.xlu1 %v285_v27 }
 0x240   :  { %v282_v28 = vpop.xlane.xlu1 %281 }
 0x241   :  { %370 = vlog2.f32 %v282_v28 }
 0x244   :  { %v287_v29 = vpop.xlane.xlu1 %286 }
 0x245   :  { %372 = vlog2.f32 %v287_v29 }
 0x24b   :  { %v371_v30 = vpop.eup %370 }
 0x24c   :  { %v289_v31 = vmul.f32 0.6931472, %v371_v30 }
 0x24e   :  { %v292_v32 = vsub.f32 %v254_v61, %v289_v31  ;;  %v293_v33 = vsub.f32 %v255_v62, %v289_v31  ;;  %v294_v34 = vsub.f32 %v256_v63, %v289_v31  ;;  %v295_v35 = vsub.f32 %v257_v0, %v289_v31 }
 0x24f   :  { %v373_v36 = vpop.eup %372 }
 0x250   :  { %300 = vst [vmem:[#allocation7] sm:$0xff] %v292_v32  ;;  %301 = vst [vmem:[#allocation7 + $0x8] sm:$0xff] %v293_v33  ;;  %v291_v37 = vmul.f32 0.6931472, %v373_v36 }
 0x251   :  { %302 = vst [vmem:[#allocation7 + $0x10] sm:$0xff] %v294_v34  ;;  %303 = vst [vmem:[#allocation7 + $0x18] sm:$0xff] %v295_v35 }
 0x252   :  { %v296_v38 = vsub.f32 %v258_v6, %v291_v37  ;;  %v297_v39 = vsub.f32 %v259_v7, %v291_v37  ;;  %v298_v40 = vsub.f32 %v260_v8, %v291_v37  ;;  %v299_v41 = vsub.f32 %v261_v9, %v291_v37 }
 0x254   :  { %304 = vst [vmem:[#allocation7 + $0x20] sm:$0xff] %v296_v38  ;;  %305 = vst [vmem:[#allocation7 + $0x28] sm:$0xff] %v297_v39 }
 0x255   :  { %306 = vst [vmem:[#allocation7 + $0x30] sm:$0xff] %v298_v40  ;;  %307 = vst [vmem:[#allocation7 + $0x38] sm:$0xff] %v299_v41 }
 0x256   :  { %429 = shalt.err (!%p426_p6)
}
 0x257   :  { %s430_s17 = scalar_lea.hbm %s522_s3, 1024 }
 0x258   :  { %p431_p7 = scmp.ne.s32.totalorder %s522_s3, %s430_s17  ;;  %p434_p8 = scmp.lt.u32.totalorder %s430_s17, %s522_s3 }
 0x25a   :  { %p436_p9 = pnand %p434_p8, %p431_p7 }
 0x25c   :  { %439 = shalt.err (!%p436_p9)
}
 0x25d   :  { %319 = dma.vmem_to_hbm [thread:$0]  %s314_s13, 1024, %s522_s3, [#allocation4], %s450_s0, %s450_s0, %s451_s9  }
 0x25e   :  { %444 = dma.done.wait [#allocation4], 1024  }
 0x25f   :  { %445 = vsyncadd [#allocation4], 4294966272 }
 0x260   :  { %323 = vsyncpa [#allocation3], 1 }
 0x261   :  { %324 = vsyncpa [#allocation6], 1 }
 0x262   :  { %325 = vsyncpa [#allocation4], 1 }

</bundles_post_ra>
